<compile_context>
chip_gen: v5e
topology: v5e:2x2
jax: 0.10.0
libtpu: 0.0.40
codegen_flags: <defaults>
</compile_context>

<pallas_src>
import functools

import jax
import jax.numpy as jnp
from jax.experimental import pallas as pl
from jax.experimental.pallas import tpu as pltpu


# ------------------------------ fused kernel -------------------------------

def _fused_kernel(xf_ref, emb_ref, m_ref, wv_ref, bv_ref, wl_ref, bl_ref,
                  mt_ref, o_ref, *, apply_threshold):
    """Per-batch fused pipeline (everything resident on-chip):

       vis_t = relu(W_vis^T @ xf_t + b_vis)        # 1x1 conv as VPU FMAs (K=C tiny)
       lf    = relu(emb @ W_lang + b_lang)         # MXU, bf16 operands / f32 acc
       lang  = (mask @ lf) / (sum(mask) + 1e-6)    # masked mean pooling
       logit = lang @ vis_t                        # (1,D) @ (D,HW)  contract D
       y     = logit @ Mt                          # fused bilinear upsample
       out   = (y >= 0) if thresholding else y     # sigmoid(y)>=0.5 <=> y>=0
    """
    xt = xf_ref[0]                                   # (C, HW2)  f32, channel-major
    wvt = wv_ref[...]                                # (D, C)    f32
    c_in, hw2 = xt.shape
    d = wvt.shape[0]

    # 1x1 conv: contraction depth is C (=4) -> VPU FMAs, not a degenerate MXU op
    acc = jnp.zeros((d, hw2), jnp.float32)
    for c in range(c_in):                            # static unroll, C is tiny
        acc = acc + wvt[:, c:c + 1] * xt[c:c + 1, :]
    vis_t = jnp.maximum(acc + bv_ref[...], 0.0)      # (D, HW2)  f32

    # language projection + ReLU (bf16 MXU operands, f32 accumulation)
    lf = jnp.dot(emb_ref[0], wl_ref[...],
                 preferred_element_type=jnp.float32) + bl_ref[...]
    lf = jnp.maximum(lf, 0.0)                        # (L, D)    f32

    # masked mean pooling as a (1, L) @ (L, D) contraction (no transposes)
    m = m_ref[0]                                     # (1, L)    f32
    denom = jnp.sum(m) + 1e-6
    lang = jnp.dot(m, lf, preferred_element_type=jnp.float32) / denom   # (1, D)

    # vision-language dot: plain (1, D) @ (D, HW2) matmul, no transposition
    logits = jnp.dot(lang, vis_t,
                     preferred_element_type=jnp.float32)                # (1, HW2)

    # bilinear (align_corners=True) resize folded into one matmul with the
    # precomputed kron(Rh, Rw)^T matrix; output slab is lane-dense (1, H*W).
    y = jnp.dot(logits.astype(mt_ref.dtype), mt_ref[...],
                preferred_element_type=jnp.float32)                     # (1, HWo)

    if apply_threshold:
        # sigmoid(y) >= 0.5  <=>  y >= 0  -> skip the EUP transcendental
        o_ref[0] = (y >= 0.0).astype(jnp.int32)
    else:
        o_ref[0] = y                                 # raw logits (return_probs path)


def fused_forward(xf_t, emb, mask3, w_vis_t, b_vis_t, w_lang, b_lang, mt,
                  apply_threshold):
    B, C, HW2 = xf_t.shape
    L, De = emb.shape[1], emb.shape[2]
    D = w_vis_t.shape[0]
    HWo = mt.shape[1]
    out_dtype = jnp.int32 if apply_threshold else jnp.float32
    kern = functools.partial(_fused_kernel, apply_threshold=apply_threshold)
    return pl.pallas_call(
        kern,
        out_shape=jax.ShapeDtypeStruct((B, 1, HWo), out_dtype),
        grid=(B,),
        in_specs=[
            pl.BlockSpec((1, C, HW2), lambda b: (b, 0, 0)),   # pooled image feats
            pl.BlockSpec((1, L, De), lambda b: (b, 0, 0)),    # token embeddings
            pl.BlockSpec((1, 1, L), lambda b: (b, 0, 0)),     # language mask row
            pl.BlockSpec((D, C), lambda b: (0, 0)),           # W_vis^T (resident)
            pl.BlockSpec((D, 1), lambda b: (0, 0)),           # b_vis   (resident)
            pl.BlockSpec((De, D), lambda b: (0, 0)),          # W_lang  (resident)
            pl.BlockSpec((1, D), lambda b: (0, 0)),           # b_lang  (resident)
            pl.BlockSpec((HW2, HWo), lambda b: (0, 0)),       # interp matrix (resident)
        ],
        out_specs=pl.BlockSpec((1, 1, HWo), lambda b: (b, 0, 0)),
        compiler_params=pltpu.CompilerParams(
            dimension_semantics=("parallel",)),
    )(xf_t, emb, mask3, w_vis_t, b_vis_t, w_lang, b_lang, mt)


# --------------------------- shape-static constants -------------------------

def _bilinear_matrix(out_size, in_size):
    """(out_size, in_size) interpolation matrix matching
    F.interpolate(mode='bilinear', align_corners=True) along one axis."""
    if in_size == 1:
        return jnp.ones((out_size, 1), jnp.float32)
    if out_size == 1:
        return jnp.zeros((1, in_size), jnp.float32).at[0, 0].set(1.0)
    i = jnp.arange(out_size, dtype=jnp.float32)
    s = i * (in_size - 1) / (out_size - 1)
    lo = jnp.clip(jnp.floor(s).astype(jnp.int32), 0, in_size - 2)
    frac = s - lo.astype(jnp.float32)
    return (jax.nn.one_hot(lo, in_size, dtype=jnp.float32) * (1.0 - frac)[:, None]
            + jax.nn.one_hot(lo + 1, in_size, dtype=jnp.float32) * frac[:, None])


@functools.lru_cache(maxsize=None)
def _interp_matrix_flat(h, w, Ho, Wo, dtype_name):
    """(h*w, Ho*Wo) flattened bilinear matrix: kron(Rh, Rw)^T.  Cached so the
    one-hot construction happens once per (in, out) size pair, not per call."""
    rh = _bilinear_matrix(Ho, h)                     # (Ho, h)
    rw = _bilinear_matrix(Wo, w)                     # (Wo, w)
    return jnp.kron(rh, rw).T.astype(jnp.dtype(dtype_name))


@functools.lru_cache(maxsize=None)
def _identity_matrix(n):
    return jnp.eye(n, dtype=jnp.float32)


# ------------------------------- params / glue ------------------------------

def init_params(key, C, D, De, vocab):
    k1, k2, k3 = jax.random.split(key, 3)
    return {
        # stored transposed (D, C) so the kernel's VPU FMA loop reads it directly
        "w_vis_t": jax.random.normal(k1, (D, C), jnp.float32) * 0.1,
        "b_vis_t": jnp.zeros((D, 1), jnp.float32),
        "embed": (jax.random.normal(k2, (vocab, De), jnp.float32) * 0.1
                  ).astype(jnp.bfloat16),                            # MXU path: bf16
        "w_lang": (jax.random.normal(k3, (De, D), jnp.float32) * 0.1
                   ).astype(jnp.bfloat16),
        "b_lang": jnp.zeros((1, D), jnp.float32),
    }


def maskris_forward(params, x, text, l_mask,
                    resize_output=True, return_probs=False, mask_ratio=0.0):
    """Mirrors MaskRIS.forward (eval path, num_classes=1, criterion=None)."""
    del mask_ratio  # forwarded to the backbone in PyTorch; synthetic one ignores it
    input_shape = x.shape[-2:]
    lang_len = l_mask.shape[1]
    B, C, H, W = x.shape
    h, w = H // 2, W // 2

    # Synthetic backbone, layout glue only (all hot compute is inside the kernel):
    # 2x2 average pool, kept channel-major (B, C, h*w) -> NO transpose needed.
    xf_t = x.reshape(B, C, h, 2, w, 2).mean(axis=(3, 5)).reshape(B, C, h * w)
    emb = params["embed"][text][:, :lang_len]        # mirrors l_feats[:, :lang_len]
    mask3 = l_mask.reshape(B, 1, lang_len).astype(jnp.float32)

    if resize_output:
        Ho, Wo = int(input_shape[0]), int(input_shape[1])
        mt = _interp_matrix_flat(h, w, Ho, Wo, "bfloat16")   # (h*w, Ho*Wo)
    else:
        Ho, Wo = h, w
        mt = _identity_matrix(h * w)                         # exact pass-through

    # TODO(synk): num_classes > 1 argmax branch and training/criterion path are
    #             not implemented (module default num_classes=1, eval path).
    apply_threshold = not return_probs
    out = fused_forward(xf_t, emb, mask3,
                        params["w_vis_t"], params["b_vis_t"],
                        params["w_lang"], params["b_lang"],
                        mt, apply_threshold)                 # (B, 1, Ho*Wo)
    return out.reshape(B, 1, Ho, Wo)


# --------------------------------- main -------------------------------------

if __name__ == "__main__":
    key = jax.random.PRNGKey(0)
    B, C, H, W = 2, 4, 16, 16        # image: NCHW
    L, vocab, De, D = 8, 16, 16, 32  # language seq / vocab / embed / hidden

    kx, kt, kp = jax.random.split(key, 3)
    x = jax.random.normal(kx, (B, C, H, W), jnp.float32)
    text = jax.random.randint(kt, (B, L), 0, vocab)
    l_mask = jnp.concatenate(
        [jnp.ones((B, 5), jnp.float32), jnp.zeros((B, 3), jnp.float32)], axis=1)

    params = init_params(kp, C, D, De, vocab)

    out = maskris_forward(params, x, text, l_mask,
                          resize_output=True, return_probs=False,
                          mask_ratio=0.0)
    out = jax.block_until_ready(out)

    assert out.shape == (B, 1, H, W), out.shape
    assert out.dtype == jnp.int32
    assert bool(jnp.all((out == 0) | (out == 1)))
    print("KERNEL_OK")
</pallas_src>

<mosaic_0001>
module attributes {stable_mosaic.version = 11 : i64} {
  func.func @_fused_kernel(%arg0: i32, %arg1: memref<1x4x64xf32, #tpu.memory_space<vmem>>, %arg2: memref<1x8x16xbf16, #tpu.memory_space<vmem>>, %arg3: memref<1x1x8xf32, #tpu.memory_space<vmem>>, %arg4: memref<32x4xf32, #tpu.memory_space<vmem>>, %arg5: memref<32x1xf32, #tpu.memory_space<vmem>>, %arg6: memref<16x32xbf16, #tpu.memory_space<vmem>>, %arg7: memref<1x32xf32, #tpu.memory_space<vmem>>, %arg8: memref<64x256xbf16, #tpu.memory_space<vmem>>, %arg9: memref<1x1x256xi32, #tpu.memory_space<vmem>>) attributes {dimension_semantics = [#tpu.dimension_semantics<parallel>], iteration_bounds = array<i64: 2>, scalar_prefetch = 0 : i64, scratch_operands = 0 : i64, tpu.core_type = #tpu.core_type<tc>, window_params = [{transform_indices = @transform_0, window_bounds = array<i64: 1, 4, 64>}, {transform_indices = @transform_1, window_bounds = array<i64: 1, 8, 16>}, {transform_indices = @transform_2, window_bounds = array<i64: 1, 1, 8>}, {pipeline_mode = #tpu.pipeline_mode<synchronous>, transform_indices = @transform_3, window_bounds = array<i64: 32, 4>}, {pipeline_mode = #tpu.pipeline_mode<synchronous>, transform_indices = @transform_4, window_bounds = array<i64: 32, 1>}, {pipeline_mode = #tpu.pipeline_mode<synchronous>, transform_indices = @transform_5, window_bounds = array<i64: 16, 32>}, {pipeline_mode = #tpu.pipeline_mode<synchronous>, transform_indices = @transform_6, window_bounds = array<i64: 1, 32>}, {pipeline_mode = #tpu.pipeline_mode<synchronous>, transform_indices = @transform_7, window_bounds = array<i64: 64, 256>}, {transform_indices = @transform_8, window_bounds = array<i64: 1, 1, 256>}]} {
    %c0 = arith.constant 0 : index
    %c0_0 = arith.constant 0 : index
    %c0_1 = arith.constant 0 : index
    %0 = vector.load %arg1[%c0, %c0_0, %c0_1] : memref<1x4x64xf32, #tpu.memory_space<vmem>>, vector<1x4x64xf32>
    %1 = vector.shape_cast %0 : vector<1x4x64xf32> to vector<4x64xf32>
    %c0_2 = arith.constant 0 : index
    %c0_3 = arith.constant 0 : index
    %2 = vector.load %arg4[%c0_2, %c0_3] : memref<32x4xf32, #tpu.memory_space<vmem>>, vector<32x4xf32>
    %cst = arith.constant 0.000000e+00 : f32
    %3 = vector.broadcast %cst : f32 to vector<32x64xf32>
    %4 = vector.extract_strided_slice %2 {offsets = [0, 0], sizes = [32, 1], strides = [1, 1]} : vector<32x4xf32> to vector<32x1xf32>
    %5 = vector.extract_strided_slice %1 {offsets = [0, 0], sizes = [1, 64], strides = [1, 1]} : vector<4x64xf32> to vector<1x64xf32>
    %6 = vector.broadcast %4 : vector<32x1xf32> to vector<32x64xf32>
    %7 = vector.broadcast %5 : vector<1x64xf32> to vector<32x64xf32>
    %8 = arith.mulf %6, %7 : vector<32x64xf32>
    %9 = arith.addf %3, %8 : vector<32x64xf32>
    %10 = vector.extract_strided_slice %2 {offsets = [0, 1], sizes = [32, 1], strides = [1, 1]} : vector<32x4xf32> to vector<32x1xf32>
    %11 = vector.extract_strided_slice %1 {offsets = [1, 0], sizes = [1, 64], strides = [1, 1]} : vector<4x64xf32> to vector<1x64xf32>
    %12 = vector.broadcast %10 : vector<32x1xf32> to vector<32x64xf32>
    %13 = vector.broadcast %11 : vector<1x64xf32> to vector<32x64xf32>
    %14 = arith.mulf %12, %13 : vector<32x64xf32>
    %15 = arith.addf %9, %14 : vector<32x64xf32>
    %16 = vector.extract_strided_slice %2 {offsets = [0, 2], sizes = [32, 1], strides = [1, 1]} : vector<32x4xf32> to vector<32x1xf32>
    %17 = vector.extract_strided_slice %1 {offsets = [2, 0], sizes = [1, 64], strides = [1, 1]} : vector<4x64xf32> to vector<1x64xf32>
    %18 = vector.broadcast %16 : vector<32x1xf32> to vector<32x64xf32>
    %19 = vector.broadcast %17 : vector<1x64xf32> to vector<32x64xf32>
    %20 = arith.mulf %18, %19 : vector<32x64xf32>
    %21 = arith.addf %15, %20 : vector<32x64xf32>
    %22 = vector.extract_strided_slice %2 {offsets = [0, 3], sizes = [32, 1], strides = [1, 1]} : vector<32x4xf32> to vector<32x1xf32>
    %23 = vector.extract_strided_slice %1 {offsets = [3, 0], sizes = [1, 64], strides = [1, 1]} : vector<4x64xf32> to vector<1x64xf32>
    %24 = vector.broadcast %22 : vector<32x1xf32> to vector<32x64xf32>
    %25 = vector.broadcast %23 : vector<1x64xf32> to vector<32x64xf32>
    %26 = arith.mulf %24, %25 : vector<32x64xf32>
    %27 = arith.addf %21, %26 : vector<32x64xf32>
    %c0_4 = arith.constant 0 : index
    %c0_5 = arith.constant 0 : index
    %28 = vector.load %arg5[%c0_4, %c0_5] : memref<32x1xf32, #tpu.memory_space<vmem>>, vector<32x1xf32>
    %29 = vector.broadcast %28 : vector<32x1xf32> to vector<32x64xf32>
    %30 = arith.addf %27, %29 : vector<32x64xf32>
    %cst_6 = arith.constant 0.000000e+00 : f32
    %31 = vector.broadcast %cst_6 : f32 to vector<32x64xf32>
    %32 = arith.maximumf %30, %31 : vector<32x64xf32>
    %c0_7 = arith.constant 0 : index
    %c0_8 = arith.constant 0 : index
    %c0_9 = arith.constant 0 : index
    %33 = vector.load %arg2[%c0_7, %c0_8, %c0_9] : memref<1x8x16xbf16, #tpu.memory_space<vmem>>, vector<1x8x16xbf16>
    %34 = vector.shape_cast %33 : vector<1x8x16xbf16> to vector<8x16xbf16>
    %c0_10 = arith.constant 0 : index
    %c0_11 = arith.constant 0 : index
    %35 = vector.load %arg6[%c0_10, %c0_11] : memref<16x32xbf16, #tpu.memory_space<vmem>>, vector<16x32xbf16>
    %cst_12 = arith.constant dense<0.000000e+00> : vector<8x32xf32>
    %36 = tpu.matmul %34, %35, %cst_12 {dimension_numbers = #tpu.dot_dimension_numbers<[1], [0], [0], [1], [0, 0, 1, 1], [], []>} : vector<8x16xbf16>, vector<16x32xbf16>, vector<8x32xf32> -> vector<8x32xf32>
    %c0_13 = arith.constant 0 : index
    %c0_14 = arith.constant 0 : index
    %37 = vector.load %arg7[%c0_13, %c0_14] : memref<1x32xf32, #tpu.memory_space<vmem>>, vector<1x32xf32>
    %38 = vector.broadcast %37 : vector<1x32xf32> to vector<8x32xf32>
    %39 = arith.addf %36, %38 : vector<8x32xf32>
    %cst_15 = arith.constant 0.000000e+00 : f32
    %40 = vector.broadcast %cst_15 : f32 to vector<8x32xf32>
    %41 = arith.maximumf %39, %40 : vector<8x32xf32>
    %c0_16 = arith.constant 0 : index
    %c0_17 = arith.constant 0 : index
    %c0_18 = arith.constant 0 : index
    %42 = vector.load %arg3[%c0_16, %c0_17, %c0_18] : memref<1x1x8xf32, #tpu.memory_space<vmem>>, vector<1x1x8xf32>
    %43 = vector.shape_cast %42 : vector<1x1x8xf32> to vector<1x8xf32>
    %44 = vector.shape_cast %43 : vector<1x8xf32> to vector<1x1x8xf32>
    %cst_19 = arith.constant dense<0.000000e+00> : vector<1xf32>
    %45 = vector.multi_reduction <add>, %44, %cst_19 [1, 2] : vector<1x1x8xf32> to vector<1xf32>
    %46 = vector.shape_cast %45 : vector<1xf32> to vector<1x1x1xf32>
    %47 = vector.extract %46[0, 0, 0] : f32 from vector<1x1x1xf32>
    %cst_20 = arith.constant 9.99999997E-7 : f32
    %48 = arith.addf %47, %cst_20 : f32
    %cst_21 = arith.constant dense<0.000000e+00> : vector<1x32xf32>
    %49 = tpu.matmul %43, %41, %cst_21 {dimension_numbers = #tpu.dot_dimension_numbers<[1], [0], [0], [1], [0, 0, 1, 1], [], []>} : vector<1x8xf32>, vector<8x32xf32>, vector<1x32xf32> -> vector<1x32xf32>
    %50 = vector.broadcast %48 : f32 to vector<1x32xf32>
    %51 = arith.divf %49, %50 : vector<1x32xf32>
    %cst_22 = arith.constant dense<0.000000e+00> : vector<1x64xf32>
    %52 = tpu.matmul %51, %32, %cst_22 {dimension_numbers = #tpu.dot_dimension_numbers<[1], [0], [0], [1], [0, 0, 1, 1], [], []>} : vector<1x32xf32>, vector<32x64xf32>, vector<1x64xf32> -> vector<1x64xf32>
    %53 = arith.truncf %52 : vector<1x64xf32> to vector<1x64xbf16>
    %c0_23 = arith.constant 0 : index
    %c0_24 = arith.constant 0 : index
    %54 = vector.load %arg8[%c0_23, %c0_24] : memref<64x256xbf16, #tpu.memory_space<vmem>>, vector<64x256xbf16>
    %cst_25 = arith.constant dense<0.000000e+00> : vector<1x256xf32>
    %55 = tpu.matmul %53, %54, %cst_25 {dimension_numbers = #tpu.dot_dimension_numbers<[1], [0], [0], [1], [0, 0, 1, 1], [], []>} : vector<1x64xbf16>, vector<64x256xbf16>, vector<1x256xf32> -> vector<1x256xf32>
    %cst_26 = arith.constant 0.000000e+00 : f32
    %56 = vector.broadcast %cst_26 : f32 to vector<1x256xf32>
    %57 = arith.cmpf oge, %55, %56 : vector<1x256xf32>
    %58 = arith.extui %57 : vector<1x256xi1> to vector<1x256xi32>
    %c0_27 = arith.constant 0 : index
    %c0_28 = arith.constant 0 : index
    %c0_29 = arith.constant 0 : index
    %59 = vector.load %arg9[%c0_27, %c0_28, %c0_29] : memref<1x1x256xi32, #tpu.memory_space<vmem>>, vector<1x1x256xi32>
    %60 = vector.shape_cast %59 : vector<1x1x256xi32> to vector<1x256xi32>
    %61 = vector.shape_cast %58 : vector<1x256xi32> to vector<1x1x256xi32>
    tpu.vector_store %arg9[%c0_27, %c0_28, %c0_29], %61 {strides = array<i32>} : memref<1x1x256xi32, #tpu.memory_space<vmem>>, vector<1x1x256xi32>,
    return
  }
  func.func @transform_0(%arg0: i32) -> (i32, i32, i32) {
    %c0_i32 = arith.constant 0 : i32
    %c0_i32_0 = arith.constant 0 : i32
    %c0_i32_1 = arith.constant 0 : i32
    return %arg0, %c0_i32, %c0_i32_0 : i32, i32, i32
  }
  func.func @transform_1(%arg0: i32) -> (i32, i32, i32) {
    %c0_i32 = arith.constant 0 : i32
    %c0_i32_0 = arith.constant 0 : i32
    %c0_i32_1 = arith.constant 0 : i32
    return %arg0, %c0_i32, %c0_i32_0 : i32, i32, i32
  }
  func.func @transform_2(%arg0: i32) -> (i32, i32, i32) {
    %c0_i32 = arith.constant 0 : i32
    %c0_i32_0 = arith.constant 0 : i32
    %c0_i32_1 = arith.constant 0 : i32
    return %arg0, %c0_i32, %c0_i32_0 : i32, i32, i32
  }
  func.func @transform_3(%arg0: i32) -> (i32, i32) {
    %c0_i32 = arith.constant 0 : i32
    %c0_i32_0 = arith.constant 0 : i32
    %c0_i32_1 = arith.constant 0 : i32
    return %c0_i32, %c0_i32_0 : i32, i32
  }
  func.func @transform_4(%arg0: i32) -> (i32, i32) {
    %c0_i32 = arith.constant 0 : i32
    %c0_i32_0 = arith.constant 0 : i32
    %c0_i32_1 = arith.constant 0 : i32
    return %c0_i32, %c0_i32_0 : i32, i32
  }
  func.func @transform_5(%arg0: i32) -> (i32, i32) {
    %c0_i32 = arith.constant 0 : i32
    %c0_i32_0 = arith.constant 0 : i32
    %c0_i32_1 = arith.constant 0 : i32
    return %c0_i32, %c0_i32_0 : i32, i32
  }
  func.func @transform_6(%arg0: i32) -> (i32, i32) {
    %c0_i32 = arith.constant 0 : i32
    %c0_i32_0 = arith.constant 0 : i32
    %c0_i32_1 = arith.constant 0 : i32
    return %c0_i32, %c0_i32_0 : i32, i32
  }
  func.func @transform_7(%arg0: i32) -> (i32, i32) {
    %c0_i32 = arith.constant 0 : i32
    %c0_i32_0 = arith.constant 0 : i32
    %c0_i32_1 = arith.constant 0 : i32
    return %c0_i32, %c0_i32_0 : i32, i32
  }
  func.func @transform_8(%arg0: i32) -> (i32, i32, i32) {
    %c0_i32 = arith.constant 0 : i32
    %c0_i32_0 = arith.constant 0 : i32
    %c0_i32_1 = arith.constant 0 : i32
    return %arg0, %c0_i32, %c0_i32_0 : i32, i32, i32
  }
}

</mosaic_0001>

<bundles_post_ra>
// kernel: tpu_custom_call.1
= control target key start
LH: loop header
LB: loop body
LE: loop exit
PB: predicated region body
PF: predicated region fallthrough
CT: control target
= control target key end

     0   :  { %s1489_s0 = inlined_call_operand.hbm [shape: f32[2,4,64], index: 0, kind: input, shape index: {}]   ;;  %s1490_s1 = inlined_call_operand.hbm [shape: bf16[2,8,16], index: 1, kind: input, shape index: {}]   ;;  %s1491_s2 = inlined_call_operand.hbm [shape: f32[2,1,8], index: 2, kind: input, shape index: {}]   ;;  %s1492_s3 = inlined_call_operand.vmem [shape: f32[32,4], index: 3, kind: input, shape index: {}]   ;;  %s1493_s4 = inlined_call_operand.vmem [shape: f32[32,1], index: 4, kind: input, shape index: {}]   ;;  %s1494_s5 = inlined_call_operand.vmem [shape: bf16[16,32], index: 5, kind: input, shape index: {}]   ;;  %s1495_s6 = inlined_call_operand.vmem [shape: f32[1,32], index: 6, kind: input, shape index: {}]   ;;  %s1496_s7 = inlined_call_operand.vmem [shape: bf16[64,256], index: 7, kind: input, shape index: {}]   ;;  %s1497_s8 = inlined_call_operand.hbm [shape: s32[2,1,256], index: 8, kind: output, shape index: {}]  }
   0x1   :  { %1504 = sst [smem:[#allocation17_spill]] %s1490_s1 }
   0x2   :  { %13 = vsyncpa [#allocation3], 0 }
   0x3   :  { %15 = vsyncpa [#allocation3 + $0x1], 0 }
   0x4   :  { %16 = vsyncpa [#allocation6], 0 }
   0x5   :  { %18 = vsyncpa [#allocation6 + $0x1], 0 }
   0x6   :  { %19 = vsyncpa [#allocation4], 0 }
   0x7   :  { %21 = vsyncpa [#allocation4 + $0x1], 0  ;;  %s1218_s27 = smov 0   ;;  %s1220_s28 = smov 0  }
   0x8   :  { %s1222_s29 = smov 0   ;;  %s1224_s30 = smov 0  }
   0x9 LB: > { %1505 = sst [smem:[#allocation12_spill]] %s1155_s27  ;;  %s1239_s9 = sadd.s32 4294967295, %s1167_s30   ;;  %s1167_s30 = sphi %s1224_s30, %s1519_s30   ;;  %s1163_s29 = sphi %s1222_s29, %s1521_s29   ;;  %s1159_s28 = sphi %s1220_s28, %s1523_s28   ;;  %s1155_s27 = sphi %s1218_s27, %s1522_s27  }
   0xa   : > { %1506 = sst [smem:[#allocation13_spill]] %s1163_s29  ;;  %s860_s10 = sadd.s32 4294967294, %s1167_s30  }
   0xb   : > { %s1243_s11 = sadd.s32 1, %s1167_s30   ;;  %s34_s12 = sadd.s32 1, %s1163_s29 }
   0xc   : > { %1507 = sst [smem:[#allocation14_spill]] %s1243_s11  ;;  %s31_s13 = ssub.s32 %s1167_s30, %s1243_s11 }
   0xd   : > { %p41_p0 = scmp.ne.s32.totalorder %s1163_s29, %s1159_s28  ;;  %p32_p1 = scmp.eq.s32.totalorder %s31_s13, 0 }
   0xe   : > { %p42_p2 = scmp.eq.s32.totalorder %s1167_s30, 0  ;;  %p47_p3 = scmp.ne.s32.totalorder %s1159_s28, %s1155_s27 }
   0xf   : > { %p48_p4 = scmp.eq.s32.totalorder %s1239_s9, 0  ;;  %p228_p7 = scmp.eq.s32.totalorder %s1239_s9, 1 }
  0x10   : > { %s1255_s14 = scalar_select %p32_p1, %s1163_s29, %s34_s12  }
  0x11   : > { %p43_p5 = por %p42_p2, %p41_p0  ;;  %p1257_p6 = por %p48_p4, %p47_p3 }
  0x12   : > { %1508 = sst [smem:[#allocation15_spill]] %s1255_s14  ;;  %p234_p8 = scmp.eq.s32.totalorder %s860_s10, 1 }
  0x13   : > { %p862_p9 = scmp.ge.s32.totalorder %s1167_s30, 2  ;;  %p949_p10 = scmp.lt.s32.totalorder %s1167_s30, 2 }
  0x14   : > { %p1264_p11 = por %p228_p7, %p41_p0  ;;  %p1268_p12 = por %p234_p8, %p47_p3 }
  0x15   : > { %s1273_s18 = sand.u32 1, %s1163_s29   ;;  %s864_s19 = sshll.u32 %s1167_s30, 2 }
  0x16   : > { %s1511_s17 = scalar_select %p1268_p12, 1, 0 }
  0x17   : > { %s1499_s20 = sshll.u32 %s1273_s18, 2  ;;  %p1277_p13 = pnand %p949_p10, %p43_p5 }
  0x18   : > { %1512 = sst [smem:[#allocation16_spill]] %s1511_s17  ;;  %s288_s22 = sand.u32 1, %s1167_s30  }
  0x19   : > { %s1514_s1 = sld [smem:[#allocation17_spill]]  ;;  %s292_s26 = scalar_lea.vmem [#allocation5], %s1499_s20 }
  0x1a   : > { %s300_s10 = sshll.u32 %s292_s26, 4  ;;  %p867_p0 = scmp.ge.s32.totalorder %s1167_s30, 1  ;;  %s301_s10 = int_to_ptr.vmem [resolvable:$true] %s300_s10 }
  0x1b   : > { %s1288_s13 = scalar_lea.sflag [#allocation6], %s288_s22  ;;  %p1011_p2 = pneg %p1277_p13 }
  0x1f   : > { %s296_s25 = scalar_lea.hbm %s1514_s1, %s864_s19  ;;  %s1014_s26 = scalar_lea.hbm %s1514_s1, 8 }
  0x20   : > { %s298_s12 = sshll.u32 %s296_s25, 4  ;;  %s299_s12 = int_to_ptr.hbm [resolvable:$true] %s298_s12 }
  0x21   : > { %s1007_s14 = sshra.s32 %s299_s12, 4  ;;  %s1008_s14 = int_to_ptr.hbm [resolvable:$true] %s1007_s14 }
  0x22   : > { %s1009_s29 = scalar_lea.hbm %s1008_s14, 4  ;;  %p1015_p5 = scmp.lt.s32.totalorder %s1008_s14, %s1514_s1 }
  0x23   : > { %p1010_p1 = scmp.ne.s32.totalorder %s1008_s14, %s1009_s29  ;;  %p1016_p7 = scmp.lt.s32.totalorder %s1014_s26, %s1009_s29 }
  0x25   : > { %p1012_p3 = pnand %p1011_p2, %p1010_p1  ;;  %p1017_p8 = por %p1016_p7, %p1015_p5 }
  0x27   : > { %p1013_p4 = pneg %p1012_p3 }
  0x29   : > { %p1018_p10 = pnand %p1017_p8, %p1013_p4 }
  0x2b   : > { %1021 = shalt.err (!%p1018_p10)
}
  0x2c   : > { %941 = dma.hbm_to_vmem [thread:$0]  (!%p1277_p13), %s299_s12, 64, %s301_s10, %s1288_s13  }
  0x2d   : > { %p322_p1 = scmp.lt.s32.totalorder %s1167_s30, 3  ;;  %s277_s24 = scalar_lea.hbm %s1489_s0, %s864_s19 }
  0x2e   : > { %s279_s14 = sshll.u32 %s277_s24, 4  ;;  %s1516_s20 = sshll.u32 %s1273_s18, 2  ;;  %s280_s14 = int_to_ptr.hbm [resolvable:$true] %s279_s14 }
  0x2f   : > { %p1310_p3 = pnand %p867_p0, %p322_p1  ;;  %s273_s26 = scalar_lea.vmem [#allocation2], %s1516_s20 }
  0x30   : > { %s281_s25 = sshll.u32 %s273_s26, 4  ;;  %s270_s1 = scalar_lea.sflag [#allocation3], %s1273_s18  ;;  %s282_s25 = int_to_ptr.vmem [resolvable:$true] %s281_s25 }
  0x31   : > { %s1037_s11 = sshra.s32 %s280_s14, 4  ;;  %s1044_s22 = scalar_lea.hbm %s1489_s0, 8  ;;  %s1038_s11 = int_to_ptr.hbm [resolvable:$true] %s1037_s11 }
  0x32   : > { %s1039_s10 = scalar_lea.hbm %s1038_s11, 4  ;;  %p1045_p0 = scmp.lt.s32.totalorder %s1038_s11, %s1489_s0 }
  0x33   : > { %p1040_p4 = scmp.ne.s32.totalorder %s1038_s11, %s1039_s10  ;;  %p1046_p8 = scmp.lt.s32.totalorder %s1044_s22, %s1039_s10 }
  0x35   : > { %p1042_p5 = pnand %p1040_p4, %p1011_p2  ;;  %p1047_p10 = por %p1046_p8, %p1045_p0 }
  0x37   : > { %p1043_p7 = pneg %p1042_p5 }
  0x39   : > { %p1048_p1 = pnand %p1047_p10, %p1043_p7 }
  0x3b   : > { %1051 = shalt.err (!%p1048_p1)
}
  0x3c   : > { %938 = dma.hbm_to_vmem [thread:$0]  (!%p1277_p13), %s280_s14, 64, %s282_s25, %s270_s1  }
  0x3d   : > { %s313_s17 = scalar_lea.hbm %s1491_s2, %s1167_s30  ;;  %s310_s19 = scalar_lea.vmem [#allocation7], %s1273_s18 }
  0x3e   : > { %s317_s12 = sshll.u32 %s310_s19, 4  ;;  %s315_s27 = sshll.u32 %s313_s17, 4  ;;  %s318_s12 = int_to_ptr.vmem [resolvable:$true] %s317_s12  ;;  %s316_s27 = int_to_ptr.hbm [resolvable:$true] %s315_s27 }
  0x3f   : > { %s1067_s11 = sshra.s32 %s316_s27, 4  ;;  %s1074_s1 = scalar_lea.hbm %s1491_s2, 2  ;;  %s1068_s11 = int_to_ptr.hbm [resolvable:$true] %s1067_s11 }
  0x40   : > { %s1069_s10 = scalar_lea.hbm %s1068_s11, 1  ;;  %p1075_p0 = scmp.lt.s32.totalorder %s1068_s11, %s1491_s2 }
  0x41   : > { %p1070_p4 = scmp.ne.s32.totalorder %s1068_s11, %s1069_s10  ;;  %p1076_p8 = scmp.lt.s32.totalorder %s1074_s1, %s1069_s10 }
  0x43   : > { %p1072_p5 = pnand %p1070_p4, %p1011_p2  ;;  %p1077_p10 = por %p1076_p8, %p1075_p0 }
  0x45   : > { %p1073_p7 = pneg %p1072_p5 }
  0x47   : > { %p1078_p1 = pnand %p1077_p10, %p1073_p7 }
  0x49   : > { %1081 = shalt.err (!%p1078_p1)
}
  0x4a   : > { %944 = dma.hbm_to_vmem [thread:$0]  (!%p1277_p13), %s316_s27, 16, %s318_s12, %s1288_s13  }
  0x4b   : > { %326 = sbr.rel (%p1310_p3) target bundleno = 629 (0x275), region = 52  ;;  %s1348_s17 = sand.u32 (!%p1310_p3), 1, %s1159_s28  }
  0x4c   : > { %s868_s18 = sshll.u32 (!%p1310_p3), %s1348_s17, 2  ;;  %s329_s24 = scalar_lea.sflag (!%p1310_p3), [#allocation3], %s1348_s17 }
  0x4d   : > { %s1352_s20 = scalar_lea.vmem (!%p1310_p3), [#allocation2], %s868_s18 }
  0x50   : > { %1142 = dma.done.wait (%p1257_p6), %s329_s24, 64  }
  0x51   : > { %1144 = vsyncadd (%p1257_p6), %s329_s24, 4294967232  ;;  %s338_s27 = sand.u32 1, %s1239_s9   ;;  %s342_s13 = scalar_lea.vmem [#allocation5], %s868_s18 }
  0x52   : > { %s339_s21 = scalar_lea.sflag [#allocation6], %s338_s27 }
  0x53   : > { %1146 = dma.done.wait (%p1257_p6), %s339_s21, 80  }
  0x54   : > { %1148 = vsyncadd (%p1257_p6), %s339_s21, 4294967216  ;;  %v1169_v0 = vmov 1   ;;  %v1170_v1 = vmov 0   ;;  %vm568_vm0 = vcmask 57344   ;;  %v916_v2 = vld [vmem:[%s1494_s5] sm:$0xff]  ;;  %v399_v3 = vld [vmem:[%s1492_s3 + $0x18] sm:$0xff] }
  0x55   : > { %988 = vset.pattern.permute.xlu1 %v1169_v0  ;;  %990 = vset.pattern.permute.xlu2 %v1169_v0  ;;  %v398_v4 = vld [vmem:[%s1492_s3 + $0x10] sm:$0xff]  ;;  %s351_s10 = scalar_lea.vmem [#allocation7], %s1348_s17  ;;  %v536_v6 = vld [vmem:[%s342_s13] sm:$0xf]  ;;  %vm549_vm1 = vcmask 130048   ;;  %v1171_v8 = vmov 2  }
  0x56   : > { %987 = vset.pattern.permute.xlu0 %v1170_v1  ;;  %442 = vperm.xlu1 %988, %v399_v3   ;;  %v1374_v5 = vld [vmem:[%s351_s10] sm:$0x1]  ;;  %v397_v9 = vld [vmem:[%s1492_s3 + $0x8] sm:$0xff]  ;;  %v1172_v10 = vmov 3   ;;  %v507_v13 = vld [vmem:[%s1493_s4 + $0x18] sm:$0xff]  ;;  %vm580_vm2 = vcmask 64512  }
  0x57   : > { %560 = vmatpush.bf16.msra.mxu0 %v916_v2  ;;  %v569_v7 = vsel %vm568_vm0, %v1374_v5, 0.0  ;;  %438 = vperm.xlu2 %990, %v398_v4   ;;  %v396_v11 = vld [vmem:[%s1492_s3] sm:$0xff]  ;;  %v505_v12 = vld [vmem:[%s1493_s4 + $0x8] sm:$0xff]  ;;  %v506_v14 = vld [vmem:[%s1493_s4 + $0x10] sm:$0xff]  ;;  %vm620_vm7 = vcmask 261120   ;;  %vm693_vm8 = vcmask 523264  }
  0x58   : > { %570 = vadd.xlane.f32.xlu0 %v569_v7  ;;  %v504_v15 = vld [vmem:[%s1493_s4] sm:$0xff]  ;;  %s913_s19 = sshll.u32 %s1239_s9, 1  ;;  %s870_s12 = sshll.u32 %s1348_s17, 1  ;;  %vm728_vm10 = vcmask 1040384  }
  0x59   : > { %v1004_v26 = vld [vmem:[%s1495_s6] ss:$0 sm:$0xff]  ;;  %s746_s15 = scalar_lea.hbm %s1497_s8, %s913_s19  ;;  %s393_s10 = scalar_lea.vmem [#allocation8], %s870_s12 }
  0x5a   : > { %875 = vmatmul.msk.bf16.vlgmr.msra.gmra.mxu0 %vm549_vm1, %v536_v6  ;;  %v395_v32 = vld [vmem:[%s1352_s20] sm:$0xf]  ;;  %s748_s22 = sshll.u32 %s393_s10, 4  ;;  %s750_s23 = sshll.u32 %s746_s15, 4  ;;  %s749_s22 = int_to_ptr.vmem [resolvable:$true] %s748_s22  ;;  %s751_s23 = int_to_ptr.hbm [resolvable:$true] %s750_s23 }
  0x5b   : > { %v445_v35 = vperm.slane %v395_v32, 1  ;;  %v420_v36 = vperm.slane %v395_v32, 0  ;;  %v470_v40 = vperm.slane %v395_v32, 2  ;;  %v495_v45 = vperm.slane %v395_v32, 3  ;;  %v896_v32 = vld [vmem:[%s1496_s7 + $0x20] sm:$0xf] }
  0x5c   : > { %s736_s9 = scalar_lea.sflag [#allocation4], %s1348_s17  ;;  %s1111_s1 = sshra.s32 %s751_s23, 4  ;;  %s1112_s1 = int_to_ptr.hbm [resolvable:$true] %s1111_s1 }
  0x5d   : > { %s1113_s14 = scalar_lea.hbm %s1112_s1, 2  ;;  %s1117_s24 = scalar_lea.hbm %s1497_s8, 4 }
  0x5e   : > { %989 = vset.pattern.permute.xlu1 %v1170_v1  ;;  %p1114_p6 = scmp.ne.s32.totalorder %s1112_s1, %s1113_s14  ;;  %p1118_p3 = scmp.lt.s32.totalorder %s1112_s1, %s1497_s8 }
  0x5f   : > { %412 = vperm.xlu1 %989, %v398_v4   ;;  %991 = vset.pattern.permute.xlu2 %v1171_v8  ;;  %p1119_p4 = scmp.lt.s32.totalorder %s1117_s24, %s1113_s14 }
  0x60   : > { %467 = vperm.xlu2 %991, %v399_v3   ;;  %p1115_p13 = pnand %p1114_p6, %p1264_p11 }
  0x61   : > { %p1120_p5 = por %p1119_p4, %p1118_p3 }
  0x62   : > { %p1116_p2 = pneg %p1115_p13 }
  0x64   : > { %p1121_p7 = pnand %p1120_p5, %p1116_p2 }
  0x67   : > { %407 = vperm.xlu1 %989, %v397_v9  }
  0x68   : > { %992 = vset.pattern.permute.xlu2 %v1169_v0 }
  0x69   : > { %434 = vperm.xlu2 %992, %v397_v9  }
  0x6c   : > { %417 = vperm.xlu0 %987, %v399_v3  }
  0x6f   : > { %993 = vset.pattern.permute.xlu1 %v1171_v8 }
  0x70   : > { %463 = vperm.xlu1 %993, %v398_v4  }
  0x71   : > { %994 = vset.pattern.permute.xlu2 %v1172_v10 }
  0x72   : > { %492 = vperm.xlu2 %994, %v399_v3  }
  0x74   : > { %999 = vset.pattern.permute.xlu0 %v1171_v8 }
  0x75   : > { %455 = vperm.xlu0 %999, %v396_v11  }
  0x78   : > { %995 = vset.pattern.permute.xlu1 %v1170_v1 }
  0x79   : > { %402 = vperm.xlu1 %995, %v396_v11  }
  0x7a   : > { %996 = vset.pattern.permute.xlu2 %v1169_v0 }
  0x7b   : > { %430 = vperm.xlu2 %996, %v396_v11  }
  0x7d   : > { %1002 = vset.pattern.permute.xlu0 %v1170_v1 }
  0x7e   : > { %515 = vperm.xlu0 %1002, %v505_v12  }
  0x81   : > { %997 = vset.pattern.permute.xlu1 %v1171_v8 }
  0x82   : > { %459 = vperm.xlu1 %997, %v397_v9  }
  0x83   : > { %998 = vset.pattern.permute.xlu2 %v1172_v10 }
  0x84   : > { %488 = vperm.xlu2 %998, %v398_v4  }
  0x8a   : > { %1000 = vset.pattern.permute.xlu1 %v1172_v10 }
  0x8b   : > { %484 = vperm.xlu1 %1000, %v397_v9  }
  0x8c   : > { %1001 = vset.pattern.permute.xlu2 %v1170_v1 }
  0x8d   : > { %525 = vperm.xlu2 %1001, %v507_v13  }
  0x93   : > { %480 = vperm.xlu1 %1000, %v396_v11  }
  0x95   : > { %520 = vperm.xlu2 %1001, %v506_v14  }
  0x9b   : > { %1003 = vset.pattern.permute.xlu1 %v1170_v1 }
  0x9c   : > { %510 = vperm.xlu1 %1003, %v504_v15  }
  0xb1   : > { %v439_v16 = vpop.permute.xlu2 %438 }
  0xb2   : > { %v448_v48 = vmul.f32 %v445_v35, %v439_v16 }
  0xba   : > { %v468_v17 = vpop.permute.xlu2 %467 }
  0xbb   : > { %v474_v44 = vmul.f32 %v470_v40, %v468_v17 }
  0xc3   : > { %v435_v22 = vpop.permute.xlu2 %434 }
  0xc4   : > { %v447_v61 = vmul.f32 %v445_v35, %v435_v22 }
  0xc8   : > { %v443_v18 = vpop.permute.xlu1 %442 }
  0xc9   : > { %v449_v41 = vmul.f32 %v445_v35, %v443_v18 }
  0xcb   : > { %v571_v19 = vpop.xlane.xlu0 %570 }
  0xcc   : > { %v572_v20 = vrot.slane %v571_v19, 4  ;;  %v493_v30 = vpop.permute.xlu2 %492 }
  0xcd   : > { %v499_v50 = vmul.f32 %v495_v45, %v493_v30 }
  0xce   : > { %v573_v21 = vadd.f32 %v572_v20, %v571_v19 }
  0xd0   : > { %v574_v23 = vrot.slane %v573_v21, 2 }
  0xd1   : > { %v413_v24 = vpop.permute.xlu1 %412 }
  0xd2   : > { %v575_v25 = vadd.f32 %v574_v23, %v573_v21  ;;  %v423_v49 = vmul.f32 %v420_v36, %v413_v24 }
  0xd4   : > { %v576_v27 = vrot.slane %v575_v25, 1  ;;  %v452_v53 = vadd.f32 %v448_v48, %v423_v49 }
  0xd5   : > { %v431_v39 = vpop.permute.xlu2 %430 }
  0xd6   : > { %v577_v28 = vadd.f32 %v576_v27, %v575_v25  ;;  %v446_v11 = vmul.f32 %v445_v35, %v431_v39  ;;  %v904_v27 = vld [vmem:[%s1496_s7 + $0x30] sm:$0xf]  ;;  %v921_v35 = vld [vmem:[%s1496_s7 + $0x24] sm:$0xf] }
  0xd7   : > { %v562_v29 = vpop.f32.mrf.mxu0  ;;  %v888_v39 = vld [vmem:[%s1496_s7 + $0x10] sm:$0xf] }
  0xd8   : > { %v563_v31 = vadd.f32 %v1004_v26, %v562_v29  ;;  %925 = vpush %v577_v28  ;;  %v924_v28 = vld [vmem:[%s1496_s7 + $0x34] sm:$0xf0]  ;;  %v923_v29 = vld [vmem:[%s1496_s7 + $0x34] sm:$0xf] }
  0xd9   : > { %v408_v33 = vpop.permute.xlu1 %407  ;;  %v905_v30 = vor.u32 %v924_v28, %v904_v27 }
  0xda   : > { %v566_v34 = vmax.f32 %v563_v31, 0.0  ;;  %v422_v62 = vmul.f32 %v420_v36, %v408_v33  ;;  %v906_v31 = vld [vmem:[%s1496_s7 + $0x38] sm:$0xf0]  ;;  %v922_v33 = vld [vmem:[%s1496_s7 + $0x24] sm:$0xf0] }
  0xdb   : > { %701 = vmatpush.bf16.msra.mxu3 %v905_v30 }
  0xdc   : > { %599 = vmatpush.msra.mxu2 %v566_v34  ;;  %v451_v4 = vadd.f32 %v447_v61, %v422_v62  ;;  %v909_v34 = vor.u32 %v923_v29, %v906_v31  ;;  %v882_v61 = vld [vmem:[%s1496_s7 + $0x8] sm:$0xf0] }
  0xdd   : > { %876 = vmatmul.msk.f32.vlgmr.msra.gmra.mxu2 %vm580_vm2, %v1374_v5 }
  0xde   : > { %v418_v37 = vpop.permute.xlu0 %417  ;;  %v489_v47 = vpop.permute.xlu2 %488  ;;  %714 = vmatpush.bf16.msra.mxu1 %v909_v34 }
  0xdf   : > { %v564_v38 = vpop.f32.mrf.mxu0  ;;  %v424_v42 = vmul.f32 %v420_v36, %v418_v37  ;;  %v498_v58 = vmul.f32 %v495_v45, %v489_v47  ;;  %v897_v37 = vor.u32 %v922_v33, %v896_v32 }
  0xe1   : > { %v453_v46 = vadd.f32 %v449_v41, %v424_v42  ;;  %v919_v41 = vld [vmem:[%s1496_s7 + $0x14] sm:$0xf]  ;;  %v890_v42 = vld [vmem:[%s1496_s7 + $0x18] sm:$0xf0]  ;;  %702 = vmatpush.bf16.msra.mxu3 %v897_v37 }
  0xe2   : > { %v464_v43 = vpop.permute.xlu1 %463 }
  0xe3   : > { %v478_v51 = vadd.f32 %v474_v44, %v453_v46  ;;  %v473_v54 = vmul.f32 %v470_v40, %v464_v43 }
  0xe5   : > { %v503_v55 = vadd.f32 %v499_v50, %v478_v51  ;;  %v477_v57 = vadd.f32 %v473_v54, %v452_v53 }
  0xe7   : > { %v526_v56 = vpop.permute.xlu2 %525  ;;  %v502_v0 = vadd.f32 %v498_v58, %v477_v57  ;;  %v456_v2 = vpop.permute.xlu0 %455  ;;  %v880_v57 = vld [vmem:[%s1496_s7] sm:$0xf]  ;;  %v918_v58 = vld [vmem:[%s1496_s7 + $0x4] sm:$0xf0] }
  0xe8   : > { %v531_v59 = vadd.f32 %v526_v56, %v503_v55  ;;  %v471_v17 = vmul.f32 %v470_v40, %v456_v2 }
  0xea   : > { %v535_v60 = vmax.f32 %v531_v59, 0.0  ;;  %v917_v59 = vld [vmem:[%s1496_s7 + $0x4] sm:$0xf] }
  0xeb   : > { %v403_v52 = vpop.permute.xlu1 %402  ;;  %v885_v62 = vor.u32 %v917_v59, %v882_v61 }
  0xec   : > { %636 = vmatpush.msrb.mxu2 %v535_v60  ;;  %v421_v12 = vmul.f32 %v420_v36, %v403_v52  ;;  %v898_v36 = vld [vmem:[%s1496_s7 + $0x28] sm:$0xf0]  ;;  %v881_v60 = vor.u32 %v918_v58, %v880_v57 }
  0xed   : > { %v901_v38 = vor.u32 %v921_v35, %v898_v36 }
  0xee   : > { %v450_v16 = vadd.f32 %v446_v11, %v421_v12 }
  0xef   : > { %v521_v3 = vpop.permute.xlu2 %520  ;;  %715 = vmatpush.bf16.msra.mxu1 %v901_v38 }
  0xf0   : > { %v530_v6 = vadd.f32 %v521_v3, %v502_v0  ;;  %v516_v13 = vpop.permute.xlu0 %515  ;;  %v475_v20 = vadd.f32 %v471_v17, %v450_v16  ;;  %v730_v3 = vlaneseq }
  0xf2   : > { %v534_v7 = vmax.f32 %v530_v6, 0.0  ;;  %vm732_vm12 = vcmp.lt.s32.totalorder %v730_v3, 256 }
  0xf4   : > { %v460_v63 = vpop.permute.xlu1 %459  ;;  %637 = vmatpush.msrb.mxu2 %v534_v7 }
  0xf5   : > { %v472_v5 = vmul.f32 %v470_v40, %v460_v63  ;;  %v920_v40 = vld [vmem:[%s1496_s7 + $0x14] sm:$0xf0] }
  0xf6   : > { %v889_v44 = vor.u32 %v920_v40, %v888_v39 }
  0xf7   : > { %v476_v8 = vadd.f32 %v472_v5, %v451_v4 }
  0xf8   : > { %703 = vmatpush.bf16.msra.mxu3 %v889_v44 }
  0xfc   : > { %704 = vmatpush.bf16.msra.mxu3 %v881_v60 }
  0xfd   : > { %v485_v9 = vpop.permute.xlu1 %484 }
  0xfe   : > { %v497_v10 = vmul.f32 %v495_v45, %v485_v9 }
 0x100   : > { %v501_v14 = vadd.f32 %v497_v10, %v476_v8 }
 0x102   : > { %v529_v15 = vadd.f32 %v516_v13, %v501_v14 }
 0x104   : > { %v533_v18 = vmax.f32 %v529_v15, 0.0 }
 0x105   : > { %v481_v19 = vpop.permute.xlu1 %480 }
 0x106   : > { %638 = vmatpush.msrb.mxu2 %v533_v18  ;;  %v496_v21 = vmul.f32 %v495_v45, %v481_v19  ;;  %v893_v45 = vor.u32 %v919_v41, %v890_v42 }
 0x108   : > { %v500_v22 = vadd.f32 %v496_v21, %v475_v20  ;;  %716 = vmatpush.bf16.msra.mxu1 %v893_v45 }
 0x109   : > { %s926_s20 = spop %925 }
 0x10a   : > { %s579_s11 = sadd.f32 1e-06, %s926_s20 }
 0x10c   : > { %v604_v26 = vstv %s579_s11  ;;  %717 = vmatpush.bf16.msra.mxu1 %v885_v62 }
 0x10d   : > { %1005 = vrcp.f32 %v604_v26  ;;  %vm610_vm3 = vweird.f32 %v604_v26  ;;  %v616_v49 = vand.u32 2147483648, %v604_v26  ;;  %v614_v51 = vand.u32 2147483647, %v604_v26 }
 0x10e   : > { %v511_v23 = vpop.permute.xlu1 %510 }
 0x10f   : > { %v528_v24 = vadd.f32 %v511_v23, %v500_v22  ;;  %v617_v52 = vor.u32 1.1754944e-38, %v616_v49  ;;  %vm615_vm6 = vcmp.eq.f32.partialorder %v614_v51, 8.507059e+37 }
 0x111   : > { %v532_v25 = vmax.f32 %v528_v24, 0.0 }
 0x113   : > { %639 = vmatpush.msrb.mxu2 %v532_v25  ;;  %v1006_v43 = vpop.eup %1005 }
 0x114   : > { %v606_v46 = vmul.f32 %v1006_v43, %v604_v26  ;;  %vm611_vm4 = vweird.f32 %v1006_v43 }
 0x115   : > { %vm612_vm5 = vmor %vm610_vm3, %vm611_vm4 }
 0x116   : > { %v607_v47 = vsub.f32 1.0, %v606_v46 }
 0x118   : > { %v608_v48 = vmul.f32 %v1006_v43, %v607_v47 }
 0x11a   : > { %v609_v50 = vadd.f32 %v1006_v43, %v608_v48 }
 0x11c   : > { %v613_v53 = vsel %vm612_vm5, %v1006_v43, %v609_v50 }
 0x11d   : > { %v618_v55 = vsel %vm615_vm6, %v617_v52, %v613_v53 }
 0x160   : > { %v601_v54 = vpop.f32.mrf.mxu2 }
 0x161   : > { %v619_v56 = vmul.f32 %v618_v55, %v601_v54 }
 0x163   : > { %877 = vmatmul.msk.f32.vlgmr.msrb.gmra.mxu2 %vm620_vm7, %v619_v56 }
 0x1e6   : > { %v641_v63 = vpop.f32.mrf.mxu2 }
 0x1e7   : > { %v644_v0 = vpack.c.bf16 %v641_v63, %v641_v63 }
 0x1e9   : > { %910 = vmatmul.msk.bf16.vlgmr.msra.gmra.mxu3 %vm693_vm8, %v644_v0  ;;  %911 = vmatmul.msk.bf16.vlgmr.msra.gmra.mxu1 %vm693_vm8, %v644_v0 }
 0x266   : > { %v719_v2 = vpop.f32.mrf.mxu1 }
 0x267   : > { %vm724_vm9 = vcmp.ge.f32.partialorder %v719_v2, 0.0 }
 0x268   : > { %v726_v4 = vsel %vm724_vm9, 1, %v1170_v1 }
 0x269   : > { %v727_v6 = vrot.slane %v726_v4, 7 }
 0x26c   : > { %v706_v5 = vpop.f32.mrf.mxu3 }
 0x26d   : > { %vm723_vm11 = vcmp.ge.f32.partialorder %v706_v5, 0.0 }
 0x26e   : > { %v725_v7 = vsel %vm723_vm11, 1, %v1170_v1  ;;  %v721_v8 = vpop.f32.mrf.mxu1 }
 0x26f   : > { %v729_v9 = vsel %vm728_vm10, %v725_v7, %v727_v6 }
 0x270   : > { %734 = vst.msk [vmem:[%s393_s10] sm:$0x3] %vm732_vm12, %v729_v9 }
 0x271   : > { %1124 = shalt.err (!%p1121_p7)
}
 0x272   : > { %933 = dma.vmem_to_hbm [thread:$0]  (%p1264_p11), %s749_s22, 32, %s751_s23, %s736_s9  }
 0x274   : > { %v708_v1 = vpop.f32.mrf.mxu3 }
 0x275 PF: > { %s1517_s17 = sld [smem:[#allocation12_spill]]  ;;  %p946_p0 = pnand %p862_p9, %p1268_p12 }
 0x277   : > { %p947_p8 = pneg %p946_p0 }
 0x27b   : > { %s762_s29 = sand.u32 1, %s1517_s17  }
 0x27c   : > { %s763_s26 = scalar_lea.sflag [#allocation4], %s762_s29 }
 0x27d   : > { %1150 = dma.done.wait (%p947_p8), %s763_s26, 32  }
 0x27e   : > { %1152 = vsyncadd (%p947_p8), %s763_s26, 4294967264  ;;  %s1519_s30 = sld [smem:[#allocation14_spill]]  ;;  %s1522_s27 = smov %s1159_s28 }
 0x27f   : > { %s1520_s19 = sld [smem:[#allocation13_spill]] }
 0x280   : > { %s1521_s29 = sld [smem:[#allocation15_spill]] }
 0x284   : > { %p24_p10 = scmp.ge.s32.totalorder %s1519_s30, 4  }
 0x285   : > { %s1523_s28 = smov %s1520_s19 }
 0x286   :  { %26 = sbr.rel (!%p24_p10) target bundleno = 9 (0x9), region = 121 }
 0x28b   :  { %769 = vsyncpa [#allocation3], 1 }
 0x28c   :  { %771 = vsyncpa [#allocation3 + $0x1], 1 }
 0x28d   :  { %772 = vsyncpa [#allocation6], 1 }
 0x28e   :  { %774 = vsyncpa [#allocation6 + $0x1], 1 }
 0x28f   :  { %775 = vsyncpa [#allocation4], 1 }
 0x290   :  { %777 = vsyncpa [#allocation4 + $0x1], 1 }

</bundles_post_ra>
